<compile_context>
chip_gen: v6e
topology: v6e:2x2x1
jax: 0.10.0
libtpu: 0.0.40
codegen_flags: <defaults>
</compile_context>

<pallas_src>
import jax
import jax.numpy as jnp
from jax.experimental import pallas as pl
from jax.experimental.pallas import tpu as pltpu


def scaling_kernel(x_ref, shift_ref, inv_scale_ref, o_ref):
    # x_ref / o_ref: (N*C, chunk) VMEM tiles.
    # shift_ref / inv_scale_ref: (N*C, 1) VMEM tiles, broadcast along lanes.
    o_ref[...] = (x_ref[...] - shift_ref[...]) * inv_scale_ref[...]


def _pick_chunk(hw, nc, itemsize, target_bytes):
    """Largest lane-dense (multiple-of-128) divisor of hw whose (nc, chunk)
    f32 tile stays around `target_bytes`; falls back to the full spatial
    extent (a full-dim block is always layout-legal)."""
    max_elems = max(128, target_bytes // (itemsize * nc))
    if hw <= max_elems:
        return hw
    best = None
    c = 128
    while c <= max_elems:
        if hw % c == 0:
            best = c
        c += 128
    return best if best is not None else hw


def scaling_layer(x, shift, scale, *, target_tile_bytes=1 << 20):
    """x: (N, 3, H, W). shift, scale: (3,). Returns (x - shift) / scale."""
    N, C, H, W = x.shape
    assert C == shift.shape[0] == scale.shape[0]
    NC, HW = N * C, H * W

    # Flatten to (N*C, H*W): row r corresponds to (n = r // C, c = r % C).
    xf = x.reshape(NC, HW)

    # Per-row shift and reciprocal scale (divide folded into a multiply).
    shift_rows = jnp.tile(shift.astype(x.dtype), N).reshape(NC, 1)
    inv_rows = jnp.tile((1.0 / scale).astype(x.dtype), N).reshape(NC, 1)

    chunk = _pick_chunk(HW, NC, jnp.dtype(x.dtype).itemsize, target_tile_bytes)
    n_chunks = HW // chunk

    out = pl.pallas_call(
        scaling_kernel,
        out_shape=jax.ShapeDtypeStruct((NC, HW), x.dtype),
        grid=(n_chunks,),
        in_specs=[
            pl.BlockSpec((NC, chunk), lambda j: (0, j)),
            pl.BlockSpec((NC, 1), lambda j: (0, 0)),
            pl.BlockSpec((NC, 1), lambda j: (0, 0)),
        ],
        out_specs=pl.BlockSpec((NC, chunk), lambda j: (0, j)),
        compiler_params=pltpu.CompilerParams(
            dimension_semantics=("parallel",),
        ),
    )(xf, shift_rows, inv_rows)

    return out.reshape(N, C, H, W)


if __name__ == "__main__":
    # Fixed per-channel buffers from the module __init__ (not learned).
    shift = jnp.array([-0.030, -0.088, -0.188], dtype=jnp.float32)
    scale = jnp.array([0.458, 0.448, 0.450], dtype=jnp.float32)

    # Small NCHW input consistent with the forward (3 channels required).
    key = jax.random.PRNGKey(0)
    x = jax.random.normal(key, (2, 3, 16, 16), dtype=jnp.float32)

    out = scaling_layer(x, shift, scale)
    out = jax.block_until_ready(out)

    # Pure-JAX reference check (same broadcasting as the PyTorch module).
    ref = (x - shift[None, :, None, None]) / scale[None, :, None, None]
    assert out.shape == x.shape and out.dtype == x.dtype
    assert jnp.allclose(out, ref, atol=1e-5, rtol=1e-5)

    print("KERNEL_OK")
</pallas_src>

<mosaic_0001>
module attributes {stable_mosaic.version = 11 : i64} {
  func.func @scaling_kernel(%arg0: i32, %arg1: memref<6x256xf32, #tpu.memory_space<vmem>>, %arg2: memref<6x1xf32, #tpu.memory_space<vmem>>, %arg3: memref<6x1xf32, #tpu.memory_space<vmem>>, %arg4: memref<6x256xf32, #tpu.memory_space<vmem>>) attributes {dimension_semantics = [#tpu.dimension_semantics<parallel>], iteration_bounds = array<i64: 1>, scalar_prefetch = 0 : i64, scratch_operands = 0 : i64, tpu.core_type = #tpu.core_type<tc>, window_params = [{transform_indices = @transform_0, window_bounds = array<i64: 6, 256>}, {pipeline_mode = #tpu.pipeline_mode<synchronous>, transform_indices = @transform_1, window_bounds = array<i64: 6, 1>}, {pipeline_mode = #tpu.pipeline_mode<synchronous>, transform_indices = @transform_2, window_bounds = array<i64: 6, 1>}, {transform_indices = @transform_3, window_bounds = array<i64: 6, 256>}]} {
    %c0 = arith.constant 0 : index
    %c0_0 = arith.constant 0 : index
    %0 = vector.load %arg1[%c0, %c0_0] : memref<6x256xf32, #tpu.memory_space<vmem>>, vector<6x256xf32>
    %c0_1 = arith.constant 0 : index
    %c0_2 = arith.constant 0 : index
    %1 = vector.load %arg2[%c0_1, %c0_2] : memref<6x1xf32, #tpu.memory_space<vmem>>, vector<6x1xf32>
    %2 = vector.broadcast %1 : vector<6x1xf32> to vector<6x256xf32>
    %3 = arith.subf %0, %2 : vector<6x256xf32>
    %c0_3 = arith.constant 0 : index
    %c0_4 = arith.constant 0 : index
    %4 = vector.load %arg3[%c0_3, %c0_4] : memref<6x1xf32, #tpu.memory_space<vmem>>, vector<6x1xf32>
    %5 = vector.broadcast %4 : vector<6x1xf32> to vector<6x256xf32>
    %6 = arith.mulf %3, %5 : vector<6x256xf32>
    %c0_5 = arith.constant 0 : index
    %c0_6 = arith.constant 0 : index
    %7 = vector.load %arg4[%c0_5, %c0_6] : memref<6x256xf32, #tpu.memory_space<vmem>>, vector<6x256xf32>
    tpu.vector_store %arg4[%c0_5, %c0_6], %6 {strides = array<i32>} : memref<6x256xf32, #tpu.memory_space<vmem>>, vector<6x256xf32>,
    return
  }
  func.func @transform_0(%arg0: i32) -> (i32, i32) {
    %c0_i32 = arith.constant 0 : i32
    %c0_i32_0 = arith.constant 0 : i32
    return %c0_i32, %arg0 : i32, i32
  }
  func.func @transform_1(%arg0: i32) -> (i32, i32) {
    %c0_i32 = arith.constant 0 : i32
    %c0_i32_0 = arith.constant 0 : i32
    %c0_i32_1 = arith.constant 0 : i32
    return %c0_i32, %c0_i32_0 : i32, i32
  }
  func.func @transform_2(%arg0: i32) -> (i32, i32) {
    %c0_i32 = arith.constant 0 : i32
    %c0_i32_0 = arith.constant 0 : i32
    %c0_i32_1 = arith.constant 0 : i32
    return %c0_i32, %c0_i32_0 : i32, i32
  }
  func.func @transform_3(%arg0: i32) -> (i32, i32) {
    %c0_i32 = arith.constant 0 : i32
    %c0_i32_0 = arith.constant 0 : i32
    return %c0_i32, %arg0 : i32, i32
  }
}

</mosaic_0001>

<bundles_post_ra>
// kernel: tpu_custom_call.1
= control target key start
LH: loop header
LB: loop body
LE: loop exit
PB: predicated region body
PF: predicated region fallthrough
CT: control target
= control target key end

     0   :  { %v74_v1 = vmov 0   ;;  %s111_s0 = inlined_call_operand.vmem [shape: f32[6,256], index: 0, kind: input, shape index: {}]   ;;  %s112_s1 = inlined_call_operand.vmem [shape: f32[6,1], index: 1, kind: input, shape index: {}]   ;;  %s113_s2 = inlined_call_operand.vmem [shape: f32[6,1], index: 2, kind: input, shape index: {}]   ;;  %s114_s3 = inlined_call_operand.hbm [shape: f32[6,256], index: 3, kind: output, shape index: {}]  }
   0x1   :  { %v17_v0 = vld [vmem:[%s112_s1] sm:$0x3f]  ;;  %51 = vset.pattern.permute.xlu0 %v74_v1 }
   0x2   :  { %8 = vsyncpa [#allocation3], 0  ;;  %20 = vperm.xlu0 %51, %v17_v0   ;;  %v25_v2 = vld [vmem:[%s113_s2] sm:$0x3f]  ;;  %v16_v5 = vld [vmem:[%s111_s0 + $0x8] sm:$0x3f] }
   0x3   :  { %v15_v4 = vld [vmem:[%s111_s0] sm:$0x3f]  ;;  %s75_s20 = smov [#allocation2]  }
   0x4   :  { %s41_s1 = sshll.u32 %s75_s20, 4  ;;  %s42_s1 = int_to_ptr.vmem [resolvable:$true] %s41_s1 }
   0x5   :  { %s52_s2 = scalar_lea.vmem %s42_s1, 256  ;;  %p57_p1 = scmp.lt.s32.totalorder %s42_s1, %s42_s1 }
   0x6   :  { %28 = vperm.xlu0 %51, %v25_v2   ;;  %p53_p0 = scmp.ne.s32.totalorder %s42_s1, %s52_s2  ;;  %p58_p2 = scmp.lt.s32.totalorder %s52_s2, %s52_s2 }
   0x8   :  { %p59_p3 = por %p58_p2, %p57_p1 }
   0xa   :  { %p60_p4 = pnand %p59_p3, %p53_p0 }
  0x7d   :  { %v21_v3 = vpop.permute.xlu0 %20 }
  0x7e   :  { %v23_v6 = vsub.f32 %v15_v4, %v21_v3  ;;  %v24_v7 = vsub.f32 %v16_v5, %v21_v3 }
  0x81   :  { %v29_v8 = vpop.permute.xlu0 %28 }
  0x82   :  { %v31_v9 = vmul.f32 %v29_v8, %v23_v6  ;;  %v32_v10 = vmul.f32 %v29_v8, %v24_v7 }
  0x84   :  { %33 = vst [vmem:[#allocation2] sm:$0x3f] %v31_v9  ;;  %34 = vst [vmem:[#allocation2 + $0x8] sm:$0x3f] %v32_v10 }
  0x85   :  { %63 = shalt.err (!%p60_p4)
}
  0x86   :  { %44 = dma.vmem_to_hbm [thread:$0]  %s42_s1, 256, %s114_s3, [#allocation3]  }
  0x87   :  { %72 = dma.done.wait [#allocation3], 256  }
  0x88   :  { %73 = vsyncadd [#allocation3], 4294967040 }
  0x89   :  { %48 = vsyncpa [#allocation3], 1 }

</bundles_post_ra>
